<compile_context>
chip_gen: v7x
topology: tpu7x:2x2x1
jax: 0.10.0
libtpu: 0.0.40
codegen_flags: <defaults>
</compile_context>

<pallas_src>
import functools

import jax
import jax.numpy as jnp
from jax import lax
from jax.experimental import pallas as pl
from jax.experimental.pallas import tpu as pltpu

F32 = jnp.float32
BN_EPS = 1e-5
LANE = 128


def _round_up(n, m):
    return ((n + m - 1) // m) * m


def _pad_last(x, target):
    pad = target - x.shape[-1]
    if pad == 0:
        return x
    return jnp.pad(x, [(0, 0)] * (x.ndim - 1) + [(0, pad)])


# --------------------------------------------------------------------------------------
# Kernels
# --------------------------------------------------------------------------------------
def expand_conv_kernel(x_ref, w_ref, scale_ref, bias_ref, o_ref, acc_ref, *, K, W):
    """Fused 3x3/s1/p1 conv + BN + SiLU.  grid = (N, H, K); ky = program_id(2).

    x_ref:      (1, 1, W+K-1, Cin_p)  padded-input row (y + ky)
    w_ref:      (K*K, Cin_p, Ch_p)    full weight, resident across the grid
    scale/bias: (1, Ch_p)             folded inference BN
    o_ref:      (1, 1, W, Ch_p)       output row y (written once, at ky == K-1)
    acc_ref:    (W, Ch_p) f32 VMEM accumulator
    """
    ky = pl.program_id(2)

    @pl.when(ky == 0)
    def _():
        acc_ref[...] = jnp.zeros_like(acc_ref)

    row = x_ref[0, 0]                                    # (W+K-1, Cin_p)
    acc = acc_ref[...]
    for kx in range(K):                                  # unrolled tap loop
        acc = acc + jnp.dot(row[kx:kx + W, :], w_ref[ky * K + kx],
                            preferred_element_type=jnp.float32)
    acc_ref[...] = acc

    @pl.when(ky == K - 1)
    def _():
        y = acc_ref[...] * scale_ref[...] + bias_ref[...]
        o_ref[0, 0] = (y * jax.nn.sigmoid(y)).astype(o_ref.dtype)        # SiLU


def dw_conv_kernel(x_ref, w_ref, scale_ref, bias_ref, o_ref, rs_ref, acc_ref,
                   *, K, stride, Wo):
    """Depthwise KxK conv + BN + SiLU, plus per-row channel sums (SE pool side output).

    grid = (N, Ho, K); ky = program_id(2).
    x_ref:  (1, 1, Wp, Ch_p)   padded hidden-activation row (y*stride + ky)
    w_ref:  (K*K, 1, Ch_p)     depthwise taps
    o_ref:  (1, 1, Wo, Ch_p)   output row y
    rs_ref: (1, 1, 1, Ch_p)    sum over the Wo output columns of this row
    acc_ref:(Wo, Ch_p) f32
    """
    ky = pl.program_id(2)

    @pl.when(ky == 0)
    def _():
        acc_ref[...] = jnp.zeros_like(acc_ref)

    row = x_ref[0, 0]                                    # (Wp, Ch_p)
    acc = acc_ref[...]
    for kx in range(K):
        if stride == 1:
            win = row[kx:kx + Wo, :]
        else:
            # contiguous slice, then sublane decimation (no strided ref slicing)
            win = row[kx:kx + Wo * stride, :].reshape(Wo, stride, row.shape[-1])[:, 0, :]
        acc = acc + win * w_ref[ky * K + kx]
    acc_ref[...] = acc

    @pl.when(ky == K - 1)
    def _():
        y = acc_ref[...] * scale_ref[...] + bias_ref[...]
        a = y * jax.nn.sigmoid(y)                        # SiLU
        o_ref[0, 0] = a.astype(o_ref.dtype)
        rs_ref[0, 0] = jnp.sum(a, axis=0, keepdims=True).astype(rs_ref.dtype)


def se_gate_kernel(p_ref, w1_ref, b1_ref, w2_ref, b2_ref, o_ref):
    """Tiny SE MLP on pooled features: gate = sigmoid(W2 @ silu(W1 @ p + b1) + b2)."""
    h = jnp.dot(p_ref[...], w1_ref[...], preferred_element_type=jnp.float32) + b1_ref[...]
    h = h * jax.nn.sigmoid(h)                            # SiLU
    s = jnp.dot(h, w2_ref[...], preferred_element_type=jnp.float32) + b2_ref[...]
    o_ref[...] = jax.nn.sigmoid(s).astype(o_ref.dtype)


def proj_kernel(x_ref, g_ref, w_ref, scale_ref, bias_ref, o_ref):
    """Fused SE gating + 1x1 projection conv + BN (no residual)."""
    xg = x_ref[0] * g_ref[0]
    y = jnp.dot(xg, w_ref[...], preferred_element_type=jnp.float32)
    o_ref[0] = (y * scale_ref[...] + bias_ref[...]).astype(o_ref.dtype)


def proj_residual_kernel(x_ref, g_ref, w_ref, scale_ref, bias_ref, res_ref, o_ref):
    """Fused SE gating + 1x1 projection conv + BN + residual add."""
    xg = x_ref[0] * g_ref[0]
    y = jnp.dot(xg, w_ref[...], preferred_element_type=jnp.float32)
    y = y * scale_ref[...] + bias_ref[...]
    o_ref[0] = (y + res_ref[0].astype(jnp.float32)).astype(o_ref.dtype)


# --------------------------------------------------------------------------------------
# Parameter initialization (deterministic, PyTorch layouts: conv weights OIHW)
# --------------------------------------------------------------------------------------
def init_mbconv_params(key, in_channels, out_channels, kernel_size, expand_ratio, r=4):
    hidden = in_channels * expand_ratio
    se_dim = int(in_channels / r)
    ks = jax.random.split(key, 10)

    def nrm(k, shape, scale=0.1):
        return (scale * jax.random.normal(k, shape)).astype(F32)

    def bn_params(k, c):
        k1, k2, k3, k4 = jax.random.split(k, 4)
        gamma = (1.0 + 0.1 * jax.random.normal(k1, (c,))).astype(F32)
        beta = (0.1 * jax.random.normal(k2, (c,))).astype(F32)
        mean = (0.1 * jax.random.normal(k3, (c,))).astype(F32)
        var = (0.5 + jax.random.uniform(k4, (c,))).astype(F32)
        return gamma, beta, mean, var

    p = {"expand": in_channels != hidden}
    if p["expand"]:
        p["w_expand"] = nrm(ks[0], (hidden, in_channels, 3, 3))          # OIHW
        p["bn1"] = bn_params(ks[1], hidden)
    p["w_dw"] = nrm(ks[2], (hidden, 1, kernel_size, kernel_size))        # depthwise OIHW
    p["bn2"] = bn_params(ks[3], hidden)
    p["w_se1"] = nrm(ks[4], (se_dim, hidden, 1, 1))
    p["b_se1"] = nrm(ks[5], (se_dim,))
    p["w_se2"] = nrm(ks[6], (hidden, se_dim, 1, 1))
    p["b_se2"] = nrm(ks[7], (hidden,))
    p["w_proj"] = nrm(ks[8], (out_channels, hidden, 1, 1))
    p["bn3"] = bn_params(ks[9], out_channels)
    return p


def _fold_bn(bn):
    gamma, beta, mean, var = bn
    scale = gamma / jnp.sqrt(var + BN_EPS)
    bias = beta - mean * scale
    return scale[None, :].astype(F32), bias[None, :].astype(F32)


# --------------------------------------------------------------------------------------
# MBConv forward (NHWC)
# --------------------------------------------------------------------------------------
def mbconv_forward_nhwc(x, params, *, kernel_size, stride, padding,
                        in_channels, out_channels, expand_ratio):
    N, H, W, Cin = x.shape
    hidden = in_channels * expand_ratio
    use_residual = (in_channels == out_channels) and (stride == 1)

    Cin_p = _round_up(Cin, LANE)
    Ch_p = _round_up(hidden, LANE)
    Cout_p = _round_up(out_channels, LANE)
    VMEM_LIMIT = 32 * 1024 * 1024        # fits v7x's 64 MiB physical / 32 MiB scoped default

    # ---- 1) expansion: 3x3 / s1 / p1 conv + BN + SiLU (no im2col; shifted-tap matmuls) ---
    if params["expand"]:
        Ke = 3
        xp = jnp.pad(_pad_last(x, Cin_p), ((0, 0), (1, 1), (1, 1), (0, 0)))
        w_e = params["w_expand"].transpose(2, 3, 1, 0).reshape(Ke * Ke, Cin, hidden)
        w_e = jnp.pad(w_e, ((0, 0), (0, Cin_p - Cin), (0, Ch_p - hidden))).astype(F32)
        scale1, bias1 = _fold_bn(params["bn1"])
        scale1 = _pad_last(scale1, Ch_p)
        bias1 = _pad_last(bias1, Ch_p)

        cost = pl.CostEstimate(
            flops=2 * N * H * W * Ke * Ke * Cin_p * Ch_p,
            transcendentals=N * H * W * Ch_p,
            bytes_accessed=4 * (int(xp.size) + int(w_e.size) + N * H * W * Ch_p))
        h = pl.pallas_call(
            functools.partial(expand_conv_kernel, K=Ke, W=W),
            out_shape=jax.ShapeDtypeStruct((N, H, W, Ch_p), F32),
            grid=(N, H, Ke),
            in_specs=[
                pl.BlockSpec((1, 1, W + Ke - 1, Cin_p), lambda n, y, ky: (n, y + ky, 0, 0)),
                pl.BlockSpec((Ke * Ke, Cin_p, Ch_p), lambda n, y, ky: (0, 0, 0)),
                pl.BlockSpec((1, Ch_p), lambda n, y, ky: (0, 0)),
                pl.BlockSpec((1, Ch_p), lambda n, y, ky: (0, 0)),
            ],
            out_specs=pl.BlockSpec((1, 1, W, Ch_p), lambda n, y, ky: (n, y, 0, 0)),
            scratch_shapes=[pltpu.VMEM((W, Ch_p), jnp.float32)],
            compiler_params=pltpu.CompilerParams(
                dimension_semantics=("parallel", "parallel", "arbitrary"),
                vmem_limit_bytes=VMEM_LIMIT),
            cost_estimate=cost,
        )(xp, w_e, scale1, bias1)
    else:
        h = _pad_last(x, Ch_p)

    # ---- 2) depthwise KxK conv + BN + SiLU (+ SE-pool row sums as a side output) --------
    K = kernel_size
    Ho = (H + 2 * padding - K) // stride + 1
    Wo = (W + 2 * padding - K) // stride + 1
    extra = stride - 1            # right pad so strided-window reshape stays in bounds
    hp = jnp.pad(h, ((0, 0), (padding, padding), (padding, padding + extra), (0, 0)))
    Wp = W + 2 * padding + extra
    w_dw = params["w_dw"].transpose(2, 3, 1, 0).reshape(K * K, 1, hidden)
    w_dw = jnp.pad(w_dw, ((0, 0), (0, 0), (0, Ch_p - hidden))).astype(F32)
    scale2, bias2 = _fold_bn(params["bn2"])
    scale2 = _pad_last(scale2, Ch_p)
    bias2 = _pad_last(bias2, Ch_p)

    cost = pl.CostEstimate(
        flops=2 * N * Ho * Wo * K * K * Ch_p,
        transcendentals=N * Ho * Wo * Ch_p,
        bytes_accessed=4 * (int(hp.size) + int(w_dw.size) + N * Ho * Wo * Ch_p))
    d, rowsum = pl.pallas_call(
        functools.partial(dw_conv_kernel, K=K, stride=stride, Wo=Wo),
        out_shape=(jax.ShapeDtypeStruct((N, Ho, Wo, Ch_p), F32),
                   jax.ShapeDtypeStruct((N, Ho, 1, Ch_p), F32)),
        grid=(N, Ho, K),
        in_specs=[
            pl.BlockSpec((1, 1, Wp, Ch_p), lambda n, y, ky: (n, y * stride + ky, 0, 0)),
            pl.BlockSpec((K * K, 1, Ch_p), lambda n, y, ky: (0, 0, 0)),
            pl.BlockSpec((1, Ch_p), lambda n, y, ky: (0, 0)),
            pl.BlockSpec((1, Ch_p), lambda n, y, ky: (0, 0)),
        ],
        out_specs=(pl.BlockSpec((1, 1, Wo, Ch_p), lambda n, y, ky: (n, y, 0, 0)),
                   pl.BlockSpec((1, 1, 1, Ch_p), lambda n, y, ky: (n, y, 0, 0))),
        scratch_shapes=[pltpu.VMEM((Wo, Ch_p), jnp.float32)],
        compiler_params=pltpu.CompilerParams(
            dimension_semantics=("parallel", "parallel", "arbitrary"),
            vmem_limit_bytes=VMEM_LIMIT),
        cost_estimate=cost,
    )(hp, w_dw, scale2, bias2)

    # ---- 3) SE gate: pool from the dw row sums + two tiny FCs + sigmoid ------------------
    se_dim = params["w_se1"].shape[0]
    Se_p = _round_up(se_dim, LANE)
    pooled = jnp.sum(rowsum, axis=(1, 2)) / float(Ho * Wo)           # (N, Ch_p), tiny glue
    Np = _round_up(N, 8)                                             # sublane-align tiny FC
    pooled_p = jnp.pad(pooled, ((0, Np - N), (0, 0)))

    w_se1 = params["w_se1"].reshape(se_dim, hidden).T
    w_se1 = jnp.pad(w_se1, ((0, Ch_p - hidden), (0, Se_p - se_dim))).astype(F32)
    b_se1 = jnp.pad(params["b_se1"][None, :], ((0, 0), (0, Se_p - se_dim))).astype(F32)
    w_se2 = params["w_se2"].reshape(hidden, se_dim).T
    w_se2 = jnp.pad(w_se2, ((0, Se_p - se_dim), (0, Ch_p - hidden))).astype(F32)
    b_se2 = jnp.pad(params["b_se2"][None, :], ((0, 0), (0, Ch_p - hidden))).astype(F32)

    gate = pl.pallas_call(
        se_gate_kernel,
        out_shape=jax.ShapeDtypeStruct((Np, Ch_p), F32),
    )(pooled_p, w_se1, b_se1, w_se2, b_se2)
    gate = gate[:N].reshape(N, 1, Ch_p)

    # ---- 4) fused SE gating + 1x1 projection conv + BN (+ residual), row-tiled ----------
    M = Ho * Wo
    TM = M
    for cand in (1024, 512, 256, 128):
        if M % cand == 0:
            TM = cand
            break
    d_flat = d.reshape(N, M, Ch_p)
    w_p = params["w_proj"].reshape(out_channels, hidden).T
    w_p = jnp.pad(w_p, ((0, Ch_p - hidden), (0, Cout_p - out_channels))).astype(F32)
    scale3, bias3 = _fold_bn(params["bn3"])
    scale3 = _pad_last(scale3, Cout_p)
    bias3 = _pad_last(bias3, Cout_p)

    cost = pl.CostEstimate(
        flops=2 * N * M * Ch_p * Cout_p + N * M * Ch_p,
        transcendentals=0,
        bytes_accessed=4 * (N * M * Ch_p + Ch_p * Cout_p + 2 * N * M * Cout_p))
    x_spec = pl.BlockSpec((1, TM, Ch_p), lambda n, m: (n, m, 0))
    g_spec = pl.BlockSpec((1, 1, Ch_p), lambda n, m: (n, 0, 0))
    w_spec = pl.BlockSpec((Ch_p, Cout_p), lambda n, m: (0, 0))
    sb_spec = pl.BlockSpec((1, Cout_p), lambda n, m: (0, 0))
    o_spec = pl.BlockSpec((1, TM, Cout_p), lambda n, m: (n, m, 0))
    cparams = pltpu.CompilerParams(dimension_semantics=("parallel", "parallel"),
                                   vmem_limit_bytes=VMEM_LIMIT)

    if use_residual:
        res = _pad_last(x, Cout_p).reshape(N, M, Cout_p)
        out = pl.pallas_call(
            proj_residual_kernel,
            out_shape=jax.ShapeDtypeStruct((N, M, Cout_p), F32),
            grid=(N, M // TM),
            in_specs=[x_spec, g_spec, w_spec, sb_spec, sb_spec,
                      pl.BlockSpec((1, TM, Cout_p), lambda n, m: (n, m, 0))],
            out_specs=o_spec,
            compiler_params=cparams,
            cost_estimate=cost,
        )(d_flat, gate, w_p, scale3, bias3, res)
    else:
        out = pl.pallas_call(
            proj_kernel,
            out_shape=jax.ShapeDtypeStruct((N, M, Cout_p), F32),
            grid=(N, M // TM),
            in_specs=[x_spec, g_spec, w_spec, sb_spec, sb_spec],
            out_specs=o_spec,
            compiler_params=cparams,
            cost_estimate=cost,
        )(d_flat, gate, w_p, scale3, bias3)

    return out[:, :, :out_channels].reshape(N, Ho, Wo, out_channels)


# --------------------------------------------------------------------------------------
# Pure-JAX reference (same math, via lax.conv) for verification
# --------------------------------------------------------------------------------------
def mbconv_reference_nhwc(x, params, *, kernel_size, stride, padding,
                          in_channels, out_channels, expand_ratio):
    def bn(y, bnp):
        g, b, m, v = bnp
        return (y - m) / jnp.sqrt(v + BN_EPS) * g + b

    silu = lambda y: y * jax.nn.sigmoid(y)
    hidden = in_channels * expand_ratio
    use_residual = (in_channels == out_channels) and (stride == 1)
    dn = ("NHWC", "HWIO", "NHWC")

    h = x
    if params["expand"]:
        w = params["w_expand"].transpose(2, 3, 1, 0)
        h = lax.conv_general_dilated(x, w, (1, 1), [(1, 1), (1, 1)], dimension_numbers=dn)
        h = silu(bn(h, params["bn1"]))
    w_dw = params["w_dw"].transpose(2, 3, 1, 0)
    d = lax.conv_general_dilated(h, w_dw, (stride, stride),
                                 [(padding, padding), (padding, padding)],
                                 dimension_numbers=dn, feature_group_count=hidden)
    d = silu(bn(d, params["bn2"]))
    pooled = d.mean(axis=(1, 2))
    se_dim = params["w_se1"].shape[0]
    h1 = silu(pooled @ params["w_se1"].reshape(se_dim, hidden).T + params["b_se1"])
    s = jax.nn.sigmoid(h1 @ params["w_se2"].reshape(hidden, se_dim).T + params["b_se2"])
    d = d * s[:, None, None, :]
    o = jnp.einsum("nhwc,co->nhwo", d, params["w_proj"].reshape(out_channels, hidden).T)
    o = bn(o, params["bn3"])
    if use_residual:
        o = o + x
    return o


# --------------------------------------------------------------------------------------
if __name__ == "__main__":
    in_channels, out_channels = 4, 4
    kernel_size, stride, padding = 3, 1, 1
    expand_ratio, r = 4, 4
    N, H, W = 2, 16, 16

    key = jax.random.PRNGKey(0)
    kx, kp = jax.random.split(key)
    x_nchw = jax.random.normal(kx, (N, in_channels, H, W), dtype=F32)   # PyTorch-style NCHW
    params = init_mbconv_params(kp, in_channels, out_channels, kernel_size, expand_ratio, r)

    cfg = dict(kernel_size=kernel_size, stride=stride, padding=padding,
               in_channels=in_channels, out_channels=out_channels, expand_ratio=expand_ratio)

    x_nhwc = jnp.transpose(x_nchw, (0, 2, 3, 1))
    out_nhwc = mbconv_forward_nhwc(x_nhwc, params, **cfg)
    out_nchw = jnp.transpose(out_nhwc, (0, 3, 1, 2))
    jax.block_until_ready(out_nchw)

    ref_nchw = jnp.transpose(mbconv_reference_nhwc(x_nhwc, params, **cfg), (0, 3, 1, 2))
    assert out_nchw.shape == (N, out_channels, H, W)
    assert jnp.allclose(out_nchw, ref_nchw, rtol=2e-4, atol=2e-4), \
        float(jnp.max(jnp.abs(out_nchw - ref_nchw)))
    print("KERNEL_OK")
</pallas_src>

<mosaic_0001>
module attributes {stable_mosaic.version = 11 : i64} {
  func.func @expand_conv_kernel(%arg0: i32, %arg1: i32, %arg2: i32, %arg3: memref<1x1x18x128xf32, #tpu.memory_space<vmem>>, %arg4: memref<9x128x128xf32, #tpu.memory_space<vmem>>, %arg5: memref<1x128xf32, #tpu.memory_space<vmem>>, %arg6: memref<1x128xf32, #tpu.memory_space<vmem>>, %arg7: memref<1x1x16x128xf32, #tpu.memory_space<vmem>>, %arg8: memref<16x128xf32, #tpu.memory_space<vmem>>) attributes {dimension_semantics = [#tpu.dimension_semantics<parallel>, #tpu.dimension_semantics<parallel>, #tpu.dimension_semantics<arbitrary>], iteration_bounds = array<i64: 2, 16, 3>, scalar_prefetch = 0 : i64, scratch_operands = 1 : i64, tpu.core_type = #tpu.core_type<tc>, window_params = [{transform_indices = @transform_0, window_bounds = array<i64: 1, 1, 18, 128>}, {pipeline_mode = #tpu.pipeline_mode<synchronous>, transform_indices = @transform_1, window_bounds = array<i64: 9, 128, 128>}, {pipeline_mode = #tpu.pipeline_mode<synchronous>, transform_indices = @transform_2, window_bounds = array<i64: 1, 128>}, {pipeline_mode = #tpu.pipeline_mode<synchronous>, transform_indices = @transform_3, window_bounds = array<i64: 1, 128>}, {transform_indices = @transform_4, window_bounds = array<i64: 1, 1, 16, 128>}]} {
    %c0_i32 = arith.constant 0 : i32
    %0 = arith.cmpi eq, %arg2, %c0_i32 : i32
    %1 = arith.extui %0 : i1 to i32
    %c0_i32_0 = arith.constant 0 : i32
    %2 = arith.cmpi ne, %1, %c0_i32_0 : i32
    scf.if %2 {
      %cst_21 = arith.constant 0.000000e+00 : f32
      %34 = vector.broadcast %cst_21 : f32 to vector<16x128xf32>
      %c0_22 = arith.constant 0 : index
      %c0_23 = arith.constant 0 : index
      %35 = vector.load %arg8[%c0_22, %c0_23] : memref<16x128xf32, #tpu.memory_space<vmem>>, vector<16x128xf32>
      tpu.vector_store %arg8[%c0_22, %c0_23], %34 {strides = array<i32>} : memref<16x128xf32, #tpu.memory_space<vmem>>, vector<16x128xf32>,
    } else {
    }
    %c0 = arith.constant 0 : index
    %c0_1 = arith.constant 0 : index
    %c0_2 = arith.constant 0 : index
    %c0_3 = arith.constant 0 : index
    %3 = vector.load %arg3[%c0, %c0_1, %c0_2, %c0_3] : memref<1x1x18x128xf32, #tpu.memory_space<vmem>>, vector<1x1x18x128xf32>
    %4 = vector.shape_cast %3 : vector<1x1x18x128xf32> to vector<18x128xf32>
    %c0_4 = arith.constant 0 : index
    %c0_5 = arith.constant 0 : index
    %5 = vector.load %arg8[%c0_4, %c0_5] : memref<16x128xf32, #tpu.memory_space<vmem>>, vector<16x128xf32>
    %6 = vector.extract_strided_slice %4 {offsets = [0, 0], sizes = [16, 128], strides = [1, 1]} : vector<18x128xf32> to vector<16x128xf32>
    %c3_i32 = arith.constant 3 : i32
    %7 = arith.muli %arg2, %c3_i32 : i32
    %c0_i32_6 = arith.constant 0 : i32
    %8 = arith.addi %7, %c0_i32_6 : i32
    %9 = arith.index_cast %8 : i32 to index
    %c0_7 = arith.constant 0 : index
    %c0_8 = arith.constant 0 : index
    %10 = vector.load %arg4[%9, %c0_7, %c0_8] : memref<9x128x128xf32, #tpu.memory_space<vmem>>, vector<1x128x128xf32>
    %11 = vector.shape_cast %10 : vector<1x128x128xf32> to vector<128x128xf32>
    %cst = arith.constant dense<0.000000e+00> : vector<16x128xf32>
    %12 = tpu.matmul %6, %11, %cst {dimension_numbers = #tpu.dot_dimension_numbers<[1], [0], [0], [1], [0, 0, 1, 1], [], []>} : vector<16x128xf32>, vector<128x128xf32>, vector<16x128xf32> -> vector<16x128xf32>
    %13 = arith.addf %5, %12 : vector<16x128xf32>
    %14 = vector.extract_strided_slice %4 {offsets = [1, 0], sizes = [16, 128], strides = [1, 1]} : vector<18x128xf32> to vector<16x128xf32>
    %c3_i32_9 = arith.constant 3 : i32
    %15 = arith.muli %arg2, %c3_i32_9 : i32
    %c1_i32 = arith.constant 1 : i32
    %16 = arith.addi %15, %c1_i32 : i32
    %17 = arith.index_cast %16 : i32 to index
    %c0_10 = arith.constant 0 : index
    %c0_11 = arith.constant 0 : index
    %18 = vector.load %arg4[%17, %c0_10, %c0_11] : memref<9x128x128xf32, #tpu.memory_space<vmem>>, vector<1x128x128xf32>
    %19 = vector.shape_cast %18 : vector<1x128x128xf32> to vector<128x128xf32>
    %cst_12 = arith.constant dense<0.000000e+00> : vector<16x128xf32>
    %20 = tpu.matmul %14, %19, %cst_12 {dimension_numbers = #tpu.dot_dimension_numbers<[1], [0], [0], [1], [0, 0, 1, 1], [], []>} : vector<16x128xf32>, vector<128x128xf32>, vector<16x128xf32> -> vector<16x128xf32>
    %21 = arith.addf %13, %20 : vector<16x128xf32>
    %22 = vector.extract_strided_slice %4 {offsets = [2, 0], sizes = [16, 128], strides = [1, 1]} : vector<18x128xf32> to vector<16x128xf32>
    %c3_i32_13 = arith.constant 3 : i32
    %23 = arith.muli %arg2, %c3_i32_13 : i32
    %c2_i32 = arith.constant 2 : i32
    %24 = arith.addi %23, %c2_i32 : i32
    %25 = arith.index_cast %24 : i32 to index
    %c0_14 = arith.constant 0 : index
    %c0_15 = arith.constant 0 : index
    %26 = vector.load %arg4[%25, %c0_14, %c0_15] : memref<9x128x128xf32, #tpu.memory_space<vmem>>, vector<1x128x128xf32>
    %27 = vector.shape_cast %26 : vector<1x128x128xf32> to vector<128x128xf32>
    %cst_16 = arith.constant dense<0.000000e+00> : vector<16x128xf32>
    %28 = tpu.matmul %22, %27, %cst_16 {dimension_numbers = #tpu.dot_dimension_numbers<[1], [0], [0], [1], [0, 0, 1, 1], [], []>} : vector<16x128xf32>, vector<128x128xf32>, vector<16x128xf32> -> vector<16x128xf32>
    %29 = arith.addf %21, %28 : vector<16x128xf32>
    %c0_17 = arith.constant 0 : index
    %c0_18 = arith.constant 0 : index
    %30 = vector.load %arg8[%c0_17, %c0_18] : memref<16x128xf32, #tpu.memory_space<vmem>>, vector<16x128xf32>
    tpu.vector_store %arg8[%c0_17, %c0_18], %29 {strides = array<i32>} : memref<16x128xf32, #tpu.memory_space<vmem>>, vector<16x128xf32>,
    %c2_i32_19 = arith.constant 2 : i32
    %31 = arith.cmpi eq, %arg2, %c2_i32_19 : i32
    %32 = arith.extui %31 : i1 to i32
    %c0_i32_20 = arith.constant 0 : i32
    %33 = arith.cmpi ne, %32, %c0_i32_20 : i32
    scf.if %33 {
      %c0_21 = arith.constant 0 : index
      %c0_22 = arith.constant 0 : index
      %34 = vector.load %arg8[%c0_21, %c0_22] : memref<16x128xf32, #tpu.memory_space<vmem>>, vector<16x128xf32>
      %c0_23 = arith.constant 0 : index
      %c0_24 = arith.constant 0 : index
      %35 = vector.load %arg5[%c0_23, %c0_24] : memref<1x128xf32, #tpu.memory_space<vmem>>, vector<1x128xf32>
      %36 = vector.broadcast %35 : vector<1x128xf32> to vector<16x128xf32>
      %37 = arith.mulf %34, %36 : vector<16x128xf32>
      %c0_25 = arith.constant 0 : index
      %c0_26 = arith.constant 0 : index
      %38 = vector.load %arg6[%c0_25, %c0_26] : memref<1x128xf32, #tpu.memory_space<vmem>>, vector<1x128xf32>
      %39 = vector.broadcast %38 : vector<1x128xf32> to vector<16x128xf32>
      %40 = arith.addf %37, %39 : vector<16x128xf32>
      %41 = arith.negf %40 : vector<16x128xf32>
      %42 = math.exp %41 : vector<16x128xf32>
      %cst_27 = arith.constant 1.000000e+00 : f32
      %43 = vector.broadcast %cst_27 : f32 to vector<16x128xf32>
      %44 = arith.addf %43, %42 : vector<16x128xf32>
      %45 = arith.divf %43, %44 : vector<16x128xf32>
      %46 = arith.mulf %40, %45 : vector<16x128xf32>
      %c0_28 = arith.constant 0 : index
      %c0_29 = arith.constant 0 : index
      %c0_30 = arith.constant 0 : index
      %c0_31 = arith.constant 0 : index
      %47 = vector.load %arg7[%c0_28, %c0_29, %c0_30, %c0_31] : memref<1x1x16x128xf32, #tpu.memory_space<vmem>>, vector<1x1x16x128xf32>
      %48 = vector.shape_cast %47 : vector<1x1x16x128xf32> to vector<16x128xf32>
      %49 = vector.shape_cast %46 : vector<16x128xf32> to vector<1x1x16x128xf32>
      tpu.vector_store %arg7[%c0_28, %c0_29, %c0_30, %c0_31], %49 {strides = array<i32>} : memref<1x1x16x128xf32, #tpu.memory_space<vmem>>, vector<1x1x16x128xf32>,
    } else {
    }
    return
  }
  func.func @transform_0(%arg0: i32, %arg1: i32, %arg2: i32) -> (i32, i32, i32, i32) {
    %0 = arith.addi %arg1, %arg2 : i32
    %c0_i32 = arith.constant 0 : i32
    %c0_i32_0 = arith.constant 0 : i32
    %c0_i32_1 = arith.constant 0 : i32
    return %arg0, %0, %c0_i32, %c0_i32_0 : i32, i32, i32, i32
  }
  func.func @transform_1(%arg0: i32, %arg1: i32, %arg2: i32) -> (i32, i32, i32) {
    %c0_i32 = arith.constant 0 : i32
    %c0_i32_0 = arith.constant 0 : i32
    %c0_i32_1 = arith.constant 0 : i32
    %c0_i32_2 = arith.constant 0 : i32
    return %c0_i32, %c0_i32_0, %c0_i32_1 : i32, i32, i32
  }
  func.func @transform_2(%arg0: i32, %arg1: i32, %arg2: i32) -> (i32, i32) {
    %c0_i32 = arith.constant 0 : i32
    %c0_i32_0 = arith.constant 0 : i32
    %c0_i32_1 = arith.constant 0 : i32
    return %c0_i32, %c0_i32_0 : i32, i32
  }
  func.func @transform_3(%arg0: i32, %arg1: i32, %arg2: i32) -> (i32, i32) {
    %c0_i32 = arith.constant 0 : i32
    %c0_i32_0 = arith.constant 0 : i32
    %c0_i32_1 = arith.constant 0 : i32
    return %c0_i32, %c0_i32_0 : i32, i32
  }
  func.func @transform_4(%arg0: i32, %arg1: i32, %arg2: i32) -> (i32, i32, i32, i32) {
    %c0_i32 = arith.constant 0 : i32
    %c0_i32_0 = arith.constant 0 : i32
    %c0_i32_1 = arith.constant 0 : i32
    return %arg0, %arg1, %c0_i32, %c0_i32_0 : i32, i32, i32, i32
  }
}

</mosaic_0001>

<bundles_post_ra>
// kernel: tpu_custom_call.1
= control target key start
LH: loop header
LB: loop body
LE: loop exit
PB: predicated region body
PF: predicated region fallthrough
CT: control target
= control target key end

     0   :  { %9 = vsyncpa [#allocation4], 0  ;;  %s1529_s0 = inlined_call_operand.vmem [shape: f32[2,18,18,128], index: 0, kind: input, shape index: {}]   ;;  %s1530_s1 = inlined_call_operand.vmem [shape: f32[9,128,128], index: 1, kind: input, shape index: {}]   ;;  %s1531_s2 = inlined_call_operand.vmem [shape: f32[1,128], index: 2, kind: input, shape index: {}]   ;;  %s1532_s3 = inlined_call_operand.vmem [shape: f32[1,128], index: 3, kind: input, shape index: {}]   ;;  %s1533_s4 = inlined_call_operand.hbm [shape: f32[2,16,16,128], index: 4, kind: output, shape index: {}]  }
   0x1   :  { %11 = vsyncpa [#allocation4 + $0x1], 0  ;;  %s1271_s15 = smov 0   ;;  %s1273_s16 = smov 0  }
   0x2   :  { %s1275_s17 = smov 0   ;;  %s1277_s18 = smov 0  }
   0x3   :  { %s1279_s19 = smov 0   ;;  %s1281_s20 = smov 0  }
   0x4   :  { %s1283_s21 = smov 0   ;;  %s1285_s22 = smov 0  }
   0x5   :  { %s1287_s23 = smov 0   ;;  %s1289_s24 = smov 0  }
   0x6 LB: > { %s715_s25 = sadd.s32 4294967295, %s1240_s24   ;;  %s716_s26 = sadd.s32 4294967294, %s1240_s24   ;;  %s1240_s24 = sphi %s1289_s24, %s17_s24   ;;  %s1236_s23 = sphi %s1287_s23, %s1550_s23   ;;  %s1232_s22 = sphi %s1285_s22, %s1549_s22   ;;  %s1228_s21 = sphi %s1283_s21, %s1548_s21   ;;  %s1224_s20 = sphi %s1281_s20, %s1547_s20   ;;  %s1220_s19 = sphi %s1279_s19, %s1546_s19   ;;  %s1216_s18 = sphi %s1277_s18, %s1545_s18   ;;  %s1212_s17 = sphi %s1275_s17, %s1544_s17   ;;  %s1208_s16 = sphi %s1273_s16, %s1543_s16   ;;  %s1204_s15 = sphi %s1271_s15, %s1542_s15  }
   0x7   : > { %s29_s27 = sadd.s32 1, %s1228_s21  ;;  %s32_s28 = sadd.s32 1, %s1232_s22 }
   0x8   : > { %p30_p0 = scmp.ge.s32.totalorder %s29_s27, 3  ;;  %s36_s29 = sadd.s32 1, %s1236_s23 }
   0x9   : > { %p148_p1 = scmp.ne.s32.totalorder %s1212_s17, %s1208_s16  ;;  %p149_p2 = scmp.eq.s32.totalorder %s715_s25, 95 }
   0xa   : > { %s1552_s27 = smov (%p30_p0, %s29_s27), 0  ;;  %s1554_s28 = smov (!%p30_p0, %s32_s28), %s1232_s22 }
   0xb   : > { %p154_p3 = scmp.ne.s32.totalorder %s1208_s16, %s1204_s15  ;;  %p34_p4 = scmp.ge.s32.totalorder %s1554_s28, 16 }
   0xc   : > { %p155_p5 = scmp.eq.s32.totalorder %s716_s26, 95  ;;  %p1333_p6 = por %p149_p2, %p148_p1 }
   0xd   : > { %s1556_s28 = smov (%p34_p4, %s1554_s28), 0  ;;  %s1558_s29 = smov (!%p34_p4, %s36_s29), %s1236_s23 }
   0xe   : > { %1537 = sst [smem:[#allocation6_spill]] %s1556_s28  ;;  %p1340_p7 = por %p155_p5, %p154_p3 }
   0xf   : > { %p719_p8 = scmp.ge.s32.totalorder %s1240_s24, 1  ;;  %p38_p9 = scmp.ge.s32.totalorder %s1558_s29, 2 }
  0x10   : > { %p196_p10 = scmp.lt.s32.totalorder %s1240_s24, 97  ;;  %s134_s6 = ssub.s32 %s1232_s22, %s1556_s28 }
  0x11   : > { %s1560_s29 = smov (%p38_p9, %s1558_s29), 0  ;;  %s138_s9 = sadd.s32 1, %s1212_s17 }
  0x12   : > { %1539 = sst [smem:[#allocation7_spill]] %s1560_s29  ;;  %p197_p11 = pnand %p719_p8, %p196_p10 }
  0x13   : > { %s133_s7 = ssub.s32 %s1236_s23, %s1560_s29  ;;  %s224_s11 = sand.u32 (!%p197_p11), 1, %s1208_s16  }
  0x14   : > { %s135_s8 = sor.u32 %s134_s6, %s133_s7  ;;  %200 = sbr.rel (%p197_p11) target bundleno = 389 (0x185), region = 36 }
  0x15   : > { %p136_p12 = scmp.eq.s32.totalorder %s135_s8, 0  ;;  %s227_s12 = sadd.s32 (!%p197_p11), %s1216_s18, %s1220_s19 }
  0x16   : > { %s720_s13 = sshll.u32 (!%p197_p11), %s224_s11, 4  ;;  %p228_p13 = scmp.lt.s32.totalorder (!%p197_p11), %s1224_s20, 1 }
  0x17   : > { %s1354_s10 = scalar_select %p136_p12, %s1212_s17, %s138_s9  }
  0x18   : > { %p230_p0 = scmp.lt.s32.totalorder (!%p197_p11), %s227_s12, 17  ;;  %s1368_s28 = scalar_lea.vmem (!%p197_p11), [#allocation3], %s720_s13 }
  0x19   : > { %p722_p1 = scmp.ne.s32.totalorder (!%p197_p11), %s1216_s18, 0 }
  0x1b   : > { %s229_s14 = scalar_select %p228_p13, %s1224_s20, 1 }
  0x1c   : > { %s1562_s12 = smov (!%p230_p0, %s227_s12), 17  ;;  %241 = sbr.rel (%p722_p1) target bundleno = 35 (0x23), region = 40 }
  0x1d   : > { %s1031_s25 = smul.u32 54, %s229_s14  ;;  %v1242_v0 = vmov (!%p722_p1), 0.0  }
  0x1e   : > { %s1030_s26 = smul.u32 3, %s1562_s12  ;;  %242 = vst [vmem:[#allocation2] sm:$0xff] (!%p722_p1), %v1242_v0  ;;  %243 = vst [vmem:[#allocation2 + $0x8] sm:$0xff] (!%p722_p1), %v1242_v0 }
  0x20   : > { %s234_s6 = sadd.s32 %s1031_s25, %s1030_s26 }
  0x21   : > { %s721_s7 = sshll.u32 %s234_s6, 3 }
  0x22   : > { %s1366_s29 = scalar_lea.vmem %s1529_s0, %s721_s7 }
  0x23 PF: > { %s723_s12 = smul.u32 384, %s1216_s18  ;;  %v1373_v1 = vld [vmem:[%s1366_s29] sm:$0xff]  ;;  %v1376_v2 = vld [vmem:[%s1366_s29 + $0x8] sm:$0xff]  ;;  %vm367_vm0 = vcmask 1046528   ;;  %v1420_v50 = vld [vmem:[%s1366_s29 + $0x10] sm:$0x3] }
  0x24   : > { %v368_v3 = vrot.slane %v1373_v1, 1  ;;  %v369_v4 = vrot.slane %v1376_v2, 1  ;;  %855 = vmatprep.mubr.f32.mxu1 %v1373_v1  ;;  %v371_v56 = vrot.slane %v1420_v50, 1  ;;  %v472_v58 = vrot.slane %v1373_v1, 2  ;;  %p758_p2 = scmp.ne.s32.totalorder %s1216_s18, 2 }
  0x25   : > { %s1384_s25 = scalar_lea.vmem %s1530_s1, %s723_s12  ;;  %v473_v59 = vrot.slane %v1376_v2, 2  ;;  %vm471_vm1 = vcmask 1045504  }
  0x26   : > { %v725_v5 = vld [vmem:[%s1384_s25 + $0x80] sm:$0xff]  ;;  %v726_v6 = vld [vmem:[%s1384_s25 + $0x88] sm:$0xff]  ;;  %v727_v7 = vld [vmem:[%s1384_s25 + $0x90] sm:$0xff]  ;;  %v370_v8 = vsel %vm367_vm0, %v368_v3, %v369_v4  ;;  %v372_v63 = vsel %vm367_vm0, %v369_v4, %v371_v56 }
  0x27   : > { %v960_v9 = vpack.c.bf16 %v726_v6, %v725_v5  ;;  %v728_v10 = vld [vmem:[%s1384_s25 + $0x98] sm:$0xff]  ;;  %890 = vmatprep.mubr.f32.mxu0 %v370_v8  ;;  %v729_v12 = vld [vmem:[%s1384_s25 + $0xa0] sm:$0xff]  ;;  %v730_v13 = vld [vmem:[%s1384_s25 + $0xa8] sm:$0xff]  ;;  %v474_v3 = vsel %vm471_vm1, %v472_v58, %v473_v59 }
  0x28   : > { %v964_v11 = vpack.c.bf16 %v728_v10, %v727_v7  ;;  %v968_v14 = vpack.c.bf16 %v730_v13, %v729_v12  ;;  %v252_v15 = vld [vmem:[%s1384_s25] sm:$0xff]  ;;  %v253_v16 = vld [vmem:[%s1384_s25 + $0x8] sm:$0xff]  ;;  %v731_v17 = vld [vmem:[%s1384_s25 + $0xb0] sm:$0xff] }
  0x29   : > { %961 = vmatprep.subr.bf16.mxu0 %v960_v9  ;;  %v732_v18 = vld [vmem:[%s1384_s25 + $0xb8] sm:$0xff]  ;;  %v928_v19 = vpack.c.bf16 %v253_v16, %v252_v15  ;;  %v254_v20 = vld [vmem:[%s1384_s25 + $0x10] sm:$0xff]  ;;  %v256_v23 = vld [vmem:[%s1384_s25 + $0x20] sm:$0xff] }
  0x2a   : > { %963 = vmatpush3.bf16.msra.mxu0 %v960_v9  ;;  %v255_v21 = vld [vmem:[%s1384_s25 + $0x18] sm:$0xff]  ;;  %v257_v24 = vld [vmem:[%s1384_s25 + $0x28] sm:$0xff]  ;;  %v972_v25 = vpack.c.bf16 %v732_v18, %v731_v17  ;;  %v733_v26 = vld [vmem:[%s1384_s25 + $0xc0] sm:$0xff] }
  0x2b   : > { %965 = vmatprep.subr.bf16.mxu0 %v964_v11  ;;  %929 = vmatprep.subr.bf16.mxu1 %v928_v19  ;;  %v932_v22 = vpack.c.bf16 %v255_v21, %v254_v20  ;;  %v734_v27 = vld [vmem:[%s1384_s25 + $0xc8] sm:$0xff]  ;;  %v936_v28 = vpack.c.bf16 %v257_v24, %v256_v23  ;;  %v258_v29 = vld [vmem:[%s1384_s25 + $0x30] sm:$0xff]  ;;  %v259_v30 = vld [vmem:[%s1384_s25 + $0x38] sm:$0xff]  ;;  %v475_v20 = vrot.slane %v1420_v50, 2 }
  0x2c   : > { %931 = vmatpush3.bf16.msra.mxu1 %v928_v19  ;;  %v976_v31 = vpack.c.bf16 %v734_v27, %v733_v26  ;;  %v735_v32 = vld [vmem:[%s1384_s25 + $0xd0] sm:$0xff]  ;;  %v736_v33 = vld [vmem:[%s1384_s25 + $0xd8] sm:$0xff]  ;;  %v940_v34 = vpack.c.bf16 %v259_v30, %v258_v29  ;;  %v260_v35 = vld [vmem:[%s1384_s25 + $0x40] sm:$0xff] }
  0x2d   : > { %933 = vmatprep.subr.bf16.mxu1 %v932_v22  ;;  %v261_v36 = vld [vmem:[%s1384_s25 + $0x48] sm:$0xff]  ;;  %v980_v37 = vpack.c.bf16 %v736_v33, %v735_v32  ;;  %v737_v38 = vld [vmem:[%s1384_s25 + $0xe0] sm:$0xff]  ;;  %v262_v41 = vld [vmem:[%s1384_s25 + $0x50] sm:$0xff]  ;;  %v476_v21 = vsel %vm471_vm1, %v473_v59, %v475_v20 }
  0x2e   : > { %967 = vmatpush3.bf16.msra.mxu0 %v964_v11  ;;  %v738_v39 = vld [vmem:[%s1384_s25 + $0xe8] sm:$0xff]  ;;  %v944_v40 = vpack.c.bf16 %v261_v36, %v260_v35  ;;  %v263_v42 = vld [vmem:[%s1384_s25 + $0x58] sm:$0xff]  ;;  %v739_v44 = vld [vmem:[%s1384_s25 + $0xf0] sm:$0xff] }
  0x2f   : > { %969 = vmatprep.subr.bf16.mxu0 %v968_v14  ;;  %v984_v43 = vpack.c.bf16 %v738_v39, %v737_v38  ;;  %v740_v45 = vld [vmem:[%s1384_s25 + $0xf8] sm:$0xff]  ;;  %v948_v46 = vpack.c.bf16 %v263_v42, %v262_v41  ;;  %v264_v47 = vld [vmem:[%s1384_s25 + $0x60] sm:$0xff]  ;;  %v265_v48 = vld [vmem:[%s1384_s25 + $0x68] sm:$0xff] }
  0x30   : > { %935 = vmatpush3.bf16.msra.mxu1 %v932_v22  ;;  %v988_v49 = vpack.c.bf16 %v740_v45, %v739_v44  ;;  %v742_v51 = vld [vmem:[%s1384_s25 + $0x100] sm:$0xff]  ;;  %v743_v52 = vld [vmem:[%s1384_s25 + $0x108] sm:$0xff]  ;;  %v952_v53 = vpack.c.bf16 %v265_v48, %v264_v47  ;;  %v266_v54 = vld [vmem:[%s1384_s25 + $0x70] sm:$0xff] }
  0x31   : > { %937 = vmatprep.subr.bf16.mxu1 %v936_v28  ;;  %v267_v55 = vld [vmem:[%s1384_s25 + $0x78] sm:$0xff]  ;;  %v992_v57 = vpack.c.bf16 %v743_v52, %v742_v51  ;;  %v744_v60 = vld [vmem:[%s1384_s25 + $0x110] sm:$0xff]  ;;  %v746_v1 = vld [vmem:[%s1384_s25 + $0x120] sm:$0xff] }
  0x32   : > { %971 = vmatpush3.bf16.msra.mxu0 %v968_v14  ;;  %v745_v61 = vld [vmem:[%s1384_s25 + $0x118] sm:$0xff]  ;;  %v956_v62 = vpack.c.bf16 %v267_v55, %v266_v54  ;;  %v747_v5 = vld [vmem:[%s1384_s25 + $0x128] sm:$0xff]  ;;  %v748_v7 = vld [vmem:[%s1384_s25 + $0x130] sm:$0xff] }
  0x33   : > { %973 = vmatprep.subr.bf16.mxu0 %v972_v25  ;;  %v996_v0 = vpack.c.bf16 %v745_v61, %v744_v60  ;;  %v1000_v6 = vpack.c.bf16 %v747_v5, %v746_v1  ;;  %v749_v4 = vld [vmem:[%s1384_s25 + $0x138] sm:$0xff]  ;;  %v750_v9 = vld [vmem:[%s1384_s25 + $0x140] sm:$0xff]  ;;  %v751_v10 = vld [vmem:[%s1384_s25 + $0x148] sm:$0xff] }
  0x34   : > { %939 = vmatpush3.bf16.msra.mxu1 %v936_v28  ;;  %v1004_v8 = vpack.c.bf16 %v749_v4, %v748_v7  ;;  %v1008_v11 = vpack.c.bf16 %v751_v10, %v750_v9  ;;  %v752_v12 = vld [vmem:[%s1384_s25 + $0x150] sm:$0xff]  ;;  %v753_v13 = vld [vmem:[%s1384_s25 + $0x158] sm:$0xff]  ;;  %v754_v15 = vld [vmem:[%s1384_s25 + $0x160] sm:$0xff] }
  0x35   : > { %941 = vmatprep.subr.bf16.mxu1 %v940_v34  ;;  %v1012_v14 = vpack.c.bf16 %v753_v13, %v752_v12  ;;  %v755_v16 = vld [vmem:[%s1384_s25 + $0x168] sm:$0xff]  ;;  %v757_v18 = vld [vmem:[%s1384_s25 + $0x178] sm:$0xff]  ;;  %v759_v33 = vld [vmem:[%s1531_s2] ss:$0 sm:$0xff] (!%p758_p2) }
  0x36   : > { %975 = vmatpush3.bf16.msra.mxu0 %v972_v25  ;;  %v1016_v17 = vpack.c.bf16 %v755_v16, %v754_v15  ;;  %v248_v24 = vld [vmem:[#allocation2 + $0x8] sm:$0xff]  ;;  %v247_v25 = vld [vmem:[#allocation2] sm:$0xff] }
  0x37   : > { %977 = vmatprep.subr.bf16.mxu0 %v976_v31 }
  0x38   : > { %943 = vmatpush3.bf16.msra.mxu1 %v940_v34  ;;  %v760_v34 = vld [vmem:[%s1532_s3] ss:$0 sm:$0xff] (!%p758_p2) }
  0x39   : > { %945 = vmatprep.subr.bf16.mxu1 %v944_v40 }
  0x3a   : > { %979 = vmatpush3.bf16.msra.mxu0 %v976_v31 }
  0x3b   : > { %981 = vmatprep.subr.bf16.mxu0 %v980_v37 }
  0x3c   : > { %947 = vmatpush3.bf16.msra.mxu1 %v944_v40 }
  0x3d   : > { %949 = vmatprep.subr.bf16.mxu1 %v948_v46 }
  0x3e   : > { %983 = vmatpush3.bf16.msra.mxu0 %v980_v37 }
  0x3f   : > { %985 = vmatprep.subr.bf16.mxu0 %v984_v43 }
  0x40   : > { %951 = vmatpush3.bf16.msra.mxu1 %v948_v46 }
  0x41   : > { %953 = vmatprep.subr.bf16.mxu1 %v952_v53 }
  0x42   : > { %987 = vmatpush3.bf16.msra.mxu0 %v984_v43 }
  0x43   : > { %989 = vmatprep.subr.bf16.mxu0 %v988_v49 }
  0x44   : > { %955 = vmatpush3.bf16.msra.mxu1 %v952_v53 }
  0x45   : > { %957 = vmatprep.subr.bf16.mxu1 %v956_v62 }
  0x46   : > { %991 = vmatpush3.bf16.msra.mxu0 %v988_v49 }
  0x47   : > { %993 = vmatprep.subr.bf16.mxu0 %v992_v57 }
  0x48   : > { %959 = vmatpush3.bf16.msra.mxu1 %v956_v62 }
  0x49   : > { %891 = vmatmul.mubr.f32.vlgmr.msra.gmra.mrb[0].mxu0 %v372_v63 }
  0x4a   : > { %995 = vmatpush3.bf16.msra.mxu0 %v992_v57  ;;  %925 = vmatprep.mubr.f32.mxu0 %v474_v3 }
  0x4b   : > { %997 = vmatprep.subr.bf16.mxu0 %v996_v0  ;;  %856 = vmatmul.mubr.f32.vlgmr.msra.gmra.mrb[0].mxu1 %v1376_v2  ;;  %v756_v2 = vld [vmem:[%s1384_s25 + $0x170] sm:$0xff] }
  0x4c   : > { %v1020_v19 = vpack.c.bf16 %v757_v18, %v756_v2 }
  0x4e   : > { %999 = vmatpush3.bf16.msra.mxu0 %v996_v0 }
  0x4f   : > { %1001 = vmatprep.subr.bf16.mxu0 %v1000_v6 }
  0x52   : > { %1003 = vmatpush3.bf16.msra.mxu0 %v1000_v6 }
  0x53   : > { %1005 = vmatprep.subr.bf16.mxu0 %v1004_v8 }
  0x56   : > { %1007 = vmatpush3.bf16.msra.mxu0 %v1004_v8 }
  0x57   : > { %1009 = vmatprep.subr.bf16.mxu0 %v1008_v11 }
  0x5a   : > { %1011 = vmatpush3.bf16.msra.mxu0 %v1008_v11 }
  0x5b   : > { %1013 = vmatprep.subr.bf16.mxu0 %v1012_v14 }
  0x5e   : > { %1015 = vmatpush3.bf16.msra.mxu0 %v1012_v14 }
  0x5f   : > { %1017 = vmatprep.subr.bf16.mxu0 %v1016_v17 }
  0x62   : > { %1019 = vmatpush3.bf16.msra.mxu0 %v1016_v17 }
  0x63   : > { %1021 = vmatprep.subr.bf16.mxu0 %v1020_v19 }
  0x66   : > { %1023 = vmatpush3.bf16.msra.mxu0 %v1020_v19 }
  0x69   : > { %926 = vmatmul.mubr.f32.vlgmr.msra.gmra.mrb[0].mxu0 %v476_v21 }
 0x11e   : > { %v857_v22 = vpop.f32.mrb[0].mxu1 }
 0x11f   : > { %v334_v23 = vpop.f32.mrb[1].mxu1  ;;  %v344_v26 = vadd.f32 %v857_v22, %v248_v24 }
 0x120   : > { %v343_v27 = vadd.f32 %v334_v23, %v247_v25 }
 0x13a   : > { %561 = sbr.rel (%p758_p2) target bundleno = 362 (0x16a), region = 44 }
 0x13c   : > { %v927_v28 = vpop.f32.mrb[0].mxu0 }
 0x13d   : > { %v1025_v29 = vadd.f32 %v927_v28, %v344_v26  ;;  %v545_v30 = vpop.f32.mrb[1].mxu0 }
 0x13e   : > { %v1027_v31 = vadd.f32 %v545_v30, %v343_v27 }
 0x13f   : > { %557 = vst [vmem:[#allocation2 + $0x8] sm:$0xff] %v1025_v29 }
 0x140   : > { %556 = vst [vmem:[#allocation2] sm:$0xff] %v1027_v31 }
 0x146   : > { %v563_v36 = vld [vmem:[#allocation2 + $0x8] sm:$0xff] }
 0x147   : > { %v562_v32 = vld [vmem:[#allocation2] sm:$0xff]  ;;  %v572_v37 = vmul.f32 %v759_v33, %v563_v36 }
 0x148   : > { %v571_v35 = vmul.f32 %v759_v33, %v562_v32 }
 0x149   : > { %v581_v39 = vadd.f32 %v760_v34, %v572_v37 }
 0x14a   : > { %v580_v38 = vadd.f32 %v760_v34, %v571_v35 }
 0x14b   : > { %v762_v41 = vmul.f32 -1.442695, %v581_v39 }
 0x14c   : > { %v761_v40 = vmul.f32 -1.442695, %v580_v38 }
 0x14e   : > { %1122 = vpow2.f32 %v761_v40 }
 0x14f   : > { %1124 = vpow2.f32 %v762_v41 }
 0x158   : > { %v1123_v42 = vpop.eup %1122 }
 0x159   : > { %v1125_v43 = vpop.eup %1124  ;;  %v588_v44 = vadd.f32 1.0, %v1123_v42 }
 0x15a   : > { %v589_v45 = vadd.f32 1.0, %v1125_v43 }
 0x15b   : > { %1126 = vrcp.f32 %v588_v44 }
 0x15c   : > { %1128 = vrcp.f32 %v589_v45 }
 0x165   : > { %v1127_v46 = vpop.eup %1126 }
 0x166   : > { %v1129_v47 = vpop.eup %1128  ;;  %v594_v48 = vmul.f32 %v1127_v46, %v580_v38 }
 0x167   : > { %v595_v49 = vmul.f32 %v1129_v47, %v581_v39 }
 0x168   : > { %596 = vst [vmem:[%s1368_s28] sm:$0xff] %v594_v48 }
 0x169   : > { %597 = vst [vmem:[%s1368_s28 + $0x8] sm:$0xff] %v595_v49 }
 0x16a PF: > { %s764_s18 = sshll.u32 %s1220_s19, 1  ;;  %s765_s8 = sshll.u32 %s1224_s20, 5 }
 0x16b   : > { %s614_s9 = sshll.u32 %s1368_s28, 4  ;;  %s611_s12 = sadd.s32 %s765_s8, %s764_s18  ;;  %s1462_s9 = int_to_ptr.vmem [resolvable:$true] %s614_s9 }
 0x16c   : > { %s766_s13 = sshll.u32 %s611_s12, 7  ;;  %s1471_s26 = scalar_lea.sflag [#allocation4], %s224_s11 }
 0x16d   : > { %s1467_s29 = scalar_lea.hbm %s1533_s4, %s766_s13  ;;  %s1130_s6 = scalar_lea.vmem %s1462_s9, 256 }
 0x16e   : > { %p1131_p3 = scmp.ne.s32.totalorder %s1462_s9, %s1130_s6  ;;  %s1243_s19 = smov [#allocation3]  }
 0x16f   : > { %s1134_s20 = sshll.u32 %s1243_s19, 4  ;;  %s1135_s20 = int_to_ptr.vmem [resolvable:$false] %s1134_s20 }
 0x170   : > { %p1132_p4 = pnand %p1131_p3, %p1333_p6  ;;  %s1136_s28 = scalar_lea.vmem %s1135_s20, 512 }
 0x171   : > { %p1137_p8 = scmp.lt.s32.totalorder %s1462_s9, %s1135_s20  ;;  %p1138_p9 = scmp.lt.s32.totalorder %s1136_s28, %s1130_s6 }
 0x172   : > { %p1133_p5 = pneg %p1132_p4 }
 0x173   : > { %p1139_p10 = por %p1138_p9, %p1137_p8 }
 0x175   : > { %p1140_p11 = pnand %p1139_p10, %p1133_p5 }
 0x177   : > { %1143 = shalt.err (!%p1140_p11)
}
 0x178   : > { %s1144_s11 = scalar_lea.hbm %s1467_s29, 256  ;;  %s1148_s8 = scalar_lea.hbm %s1533_s4, 8192 }
 0x179   : > { %p1145_p12 = scmp.ne.s32.totalorder %s1467_s29, %s1144_s11  ;;  %p1149_p1 = scmp.lt.u32.totalorder %s1467_s29, %s1533_s4 }
 0x17a   : > { %p1150_p2 = scmp.lt.u32.totalorder %s1148_s8, %s1144_s11  ;;  %p1152_p4 = scmp.lt.u32.totalorder %s1144_s11, %s1467_s29 }
 0x17b   : > { %p1146_p13 = pnand %p1145_p12, %p1333_p6 }
 0x17c   : > { %p1151_p3 = por %p1150_p2, %p1149_p1 }
 0x17d   : > { %p1147_p0 = pneg %p1146_p13 }
 0x17e   : > { %p1153_p5 = por %p1152_p4, %p1151_p3 }
 0x180   : > { %p1154_p8 = pnand %p1153_p5, %p1147_p0 }
 0x182   : > { %1157 = shalt.err (!%p1154_p8)
}
 0x183   : > { %s1244_s14 = smov 128   ;;  %s1245_s25 = smov 8  }
 0x184   : > { %1032 = dma.vmem_to_hbm [thread:$0]  (%p1333_p6), %s1462_s9, 256, %s1467_s29, %s1471_s26, %s1244_s14, %s1244_s14, %s1245_s25  }
 0x185 PF: > { %p1038_p9 = scmp.ge.s32.totalorder %s1240_s24, 2  ;;  %s629_s6 = sand.u32 1, %s1204_s15  }
 0x186   : > { %s630_s19 = scalar_lea.sflag [#allocation4], %s629_s6 }
 0x187   : > { %p1035_p10 = pnand %p1038_p9, %p1340_p7 }
 0x189   : > { %1199 = dma.done.wait (!%p1035_p10), %s630_s19, 256  }
 0x18a   : > { %1201 = vsyncadd (!%p1035_p10), %s630_s19, 4294967040  ;;  %s17_s24 = sadd.s32 1, %s1240_s24   ;;  %s1540_s30 = sld [smem:[#allocation6_spill]] }
 0x18b   : > { %p14_p11 = scmp.ge.s32.totalorder %s17_s24, 98   ;;  %s1541_s9 = sld [smem:[#allocation7_spill]] }
 0x18c   : > { %s1542_s15 = smov %s1208_s16  ;;  %s1543_s16 = smov %s1212_s17 }
 0x18d   : > { %s1544_s17 = smov %s1354_s10  ;;  %s1545_s18 = smov %s1228_s21 }
 0x18e   : > { %s1546_s19 = smov %s1232_s22  ;;  %s1547_s20 = smov %s1236_s23 }
 0x18f   : > { %s1548_s21 = smov %s1552_s27  ;;  %16 = sbr.rel (!%p14_p11) target bundleno = 6 (0x6), region = 82 }
 0x190   : > { %s1549_s22 = smov %s1540_s30 }
 0x191   : > { %s1550_s23 = smov %s1541_s9 }
 0x196   :  { %635 = vsyncpa [#allocation4], 1 }
 0x197   :  { %637 = vsyncpa [#allocation4 + $0x1], 1 }

</bundles_post_ra>
